<compile_context>
chip_gen: v5e
topology: v5e:2x2
jax: 0.10.0
libtpu: 0.0.40
codegen_flags: <defaults>
</compile_context>

<pallas_src>
import functools

import jax
import jax.numpy as jnp
from jax.experimental import pallas as pl
from jax.experimental.pallas import tpu as pltpu

NUM_BOND_TYPE = 4 + 1 + 1          # 6
NUM_BOND_DIRECTION = 3
NUM_ATOM_TYPE = 118 + 2 + 1        # 121
NUM_CHIRALITY_TAG = 4

EPS_BN = 1e-5
VMEM_LIMIT = 64 * 1024 * 1024      # explicit budget, fits v7x's 64 MiB physical VMEM


def _round_up(x, m):
    return ((x + m - 1) // m) * m


# --------------------- kernel A: GIN aggregation + MLP ----------------------

def _gin_mlp_kernel(m_ref, s_ref, w1_ref, b1_ref, w2_ref, b2_ref,
                    h2_ref, stats_ref, acc_ref, *, n_valid):
    """One row-tile of:  h2 = MLP( [A|inc] @ [h;edge_emb] )  + masked BN partial stats.

    Grid = (row_tiles, reduction_tiles); reduction axis last, f32 accumulator in VMEM.
    All matmuls are bf16 x bf16 with f32 accumulation (no in-kernel upcasts of M/S).
    """
    i = pl.program_id(0)                 # hoisted: must NOT be called inside pl.when
    k = pl.program_id(1)
    nk = pl.num_programs(1)

    @pl.when(k == 0)
    def _():
        acc_ref[...] = jnp.zeros_like(acc_ref)

    # bf16 adjacency/incidence tile  x  bf16 feature tile  ->  f32 accumulate (MXU).
    acc_ref[...] += jnp.dot(m_ref[...], s_ref[...],
                            preferred_element_type=jnp.float32)

    @pl.when(k == nk - 1)
    def _():
        aggr = acc_ref[...]                                   # f32 (tm, dp)
        # Fused GIN MLP epilogue: bf16 x bf16 matmuls, f32 accumulate, f32 bias add.
        h1 = jnp.dot(aggr.astype(jnp.bfloat16), w1_ref[...],
                     preferred_element_type=jnp.float32) + b1_ref[...]
        h1 = jnp.maximum(h1, 0.0)
        h2 = jnp.dot(h1.astype(jnp.bfloat16), w2_ref[...],
                     preferred_element_type=jnp.float32) + b2_ref[...]

        # Masked partial BatchNorm statistics (f32, padded rows excluded),
        # written as ONE lane-dense (8, dp) store.
        row = jax.lax.broadcasted_iota(jnp.int32, h2.shape, 0) + i * h2.shape[0]
        valid = (row < n_valid).astype(jnp.float32)
        h2m = h2 * valid
        ssum = jnp.sum(h2m, axis=0, keepdims=True)
        ssq = jnp.sum(h2m * h2m, axis=0, keepdims=True)
        zeros6 = jnp.zeros((6, h2.shape[1]), jnp.float32)
        stats_ref[...] = jnp.concatenate([ssum, ssq, zeros6], axis=0)

        h2_ref[...] = h2.astype(jnp.bfloat16)


def gin_mlp(m_bf16, s_bf16, w1, b1, w2, b2, *, n_valid, tm, tk):
    n_pad, k_pad = m_bf16.shape
    dp = s_bf16.shape[1]
    hp = w1.shape[1]
    nt = n_pad // tm
    kt = k_pad // tk
    kernel = functools.partial(_gin_mlp_kernel, n_valid=n_valid)
    h2, stats = pl.pallas_call(
        kernel,
        out_shape=(jax.ShapeDtypeStruct((n_pad, dp), jnp.bfloat16),
                   jax.ShapeDtypeStruct((nt * 8, dp), jnp.float32)),
        grid_spec=pltpu.PrefetchScalarGridSpec(
            num_scalar_prefetch=0,
            grid=(nt, kt),
            in_specs=[
                pl.BlockSpec((tm, tk), lambda i, k: (i, k)),      # M  (bf16)
                pl.BlockSpec((tk, dp), lambda i, k: (k, 0)),      # S  (bf16)
                pl.BlockSpec((dp, hp), lambda i, k: (0, 0)),      # W1 (bf16, resident)
                pl.BlockSpec((1, hp), lambda i, k: (0, 0)),       # b1 (f32)
                pl.BlockSpec((hp, dp), lambda i, k: (0, 0)),      # W2 (bf16, resident)
                pl.BlockSpec((1, dp), lambda i, k: (0, 0)),       # b2 (f32)
            ],
            out_specs=[
                pl.BlockSpec((tm, dp), lambda i, k: (i, 0)),      # h2 (bf16)
                pl.BlockSpec((8, dp), lambda i, k: (i, 0)),       # partial BN stats
            ],
            scratch_shapes=[pltpu.VMEM((tm, dp), jnp.float32)],
        ),
        compiler_params=pltpu.CompilerParams(
            dimension_semantics=("parallel", "arbitrary"),
            vmem_limit_bytes=VMEM_LIMIT),
    )(m_bf16, s_bf16, w1, b1, w2, b2)
    return h2, stats


# ----------------- kernel B: BatchNorm apply (+ optional ReLU) ---------------

def _bn_apply_kernel(h2_ref, scale_ref, shift_ref, out_ref, *, n_valid, apply_relu):
    i = pl.program_id(0)
    h = h2_ref[...].astype(jnp.float32) * scale_ref[...] + shift_ref[...]
    if apply_relu:
        h = jnp.maximum(h, 0.0)
    row = jax.lax.broadcasted_iota(jnp.int32, h.shape, 0) + i * h.shape[0]
    # keep padded rows exactly zero; emit bf16 to halve the h round trip
    out_ref[...] = jnp.where(row < n_valid, h, 0.0).astype(jnp.bfloat16)


def bn_apply(h2, scale, shift, *, n_valid, tm, apply_relu):
    n_pad, dp = h2.shape
    nt = n_pad // tm
    kernel = functools.partial(_bn_apply_kernel, n_valid=n_valid, apply_relu=apply_relu)
    return pl.pallas_call(
        kernel,
        out_shape=jax.ShapeDtypeStruct((n_pad, dp), jnp.bfloat16),
        grid_spec=pltpu.PrefetchScalarGridSpec(
            num_scalar_prefetch=0,
            grid=(nt,),
            in_specs=[
                pl.BlockSpec((tm, dp), lambda i: (i, 0)),
                pl.BlockSpec((1, dp), lambda i: (0, 0)),
                pl.BlockSpec((1, dp), lambda i: (0, 0)),
            ],
            out_specs=pl.BlockSpec((tm, dp), lambda i: (i, 0)),
        ),
        compiler_params=pltpu.CompilerParams(
            dimension_semantics=("parallel",),
            vmem_limit_bytes=VMEM_LIMIT),
    )(h2, scale, shift)


# -------------------- kernel C: sum-pool + prediction head -------------------

def _pool_pred_kernel(pool_ref, node_ref, wp_ref, pred_ref, acc_ref):
    k = pl.program_id(0)

    @pl.when(k == 0)
    def _():
        acc_ref[...] = jnp.zeros_like(acc_ref)

    # exact bf16 one-hot x bf16 node features -> f32 per-graph sums
    acc_ref[...] += jnp.dot(pool_ref[...], node_ref[...],
                            preferred_element_type=jnp.float32)

    @pl.when(k == pl.num_programs(0) - 1)
    def _():
        pred_ref[...] = jnp.dot(acc_ref[...].astype(jnp.bfloat16), wp_ref[...],
                                preferred_element_type=jnp.float32)


def pool_and_predict(pool_mat, node_rep, wp, *, tm):
    g_pad, n_pad = pool_mat.shape
    dp = node_rep.shape[1]
    t_pad = wp.shape[1]
    kt = n_pad // tm
    return pl.pallas_call(
        _pool_pred_kernel,
        out_shape=jax.ShapeDtypeStruct((g_pad, t_pad), jnp.float32),
        grid_spec=pltpu.PrefetchScalarGridSpec(
            num_scalar_prefetch=0,
            grid=(kt,),
            in_specs=[
                pl.BlockSpec((g_pad, tm), lambda k: (0, k)),      # one-hot pool (bf16)
                pl.BlockSpec((tm, dp), lambda k: (k, 0)),         # node_rep (bf16)
                pl.BlockSpec((dp, t_pad), lambda k: (0, 0)),      # pred_w (bf16, resident)
            ],
            out_specs=pl.BlockSpec((g_pad, t_pad), lambda k: (0, 0)),
            scratch_shapes=[pltpu.VMEM((g_pad, dp), jnp.float32)],
        ),
        compiler_params=pltpu.CompilerParams(
            dimension_semantics=("arbitrary",),
            vmem_limit_bytes=VMEM_LIMIT),
    )(pool_mat, node_rep, wp)


# ------------------------------- parameters --------------------------------

def _xavier_uniform(key, shape):
    fan_in, fan_out = shape
    limit = (6.0 / (fan_in + fan_out)) ** 0.5
    return jax.random.uniform(key, shape, jnp.float32, -limit, limit)


def _pad2(a, rows, cols):
    return jnp.pad(a, ((0, rows - a.shape[0]), (0, cols - a.shape[1])))


def init_params(key, num_layer, emb_dim, num_tasks, dp, hp, t_pad):
    """Parameters are zero-padded to lane-aligned shapes; matmul weights stored bf16."""
    keys = jax.random.split(key, 3 + num_layer * 4)
    params = {
        "x_emb1": _pad2(_xavier_uniform(keys[0], (NUM_ATOM_TYPE, emb_dim)),
                        NUM_ATOM_TYPE, dp),
        "x_emb2": _pad2(_xavier_uniform(keys[1], (NUM_CHIRALITY_TAG, emb_dim)),
                        NUM_CHIRALITY_TAG, dp),
        "pred_w": _pad2(_xavier_uniform(keys[2], (emb_dim, num_tasks)),
                        dp, t_pad).astype(jnp.bfloat16),
        "pred_b": jnp.zeros((1, t_pad), jnp.float32),
        "layers": [],
    }
    k = 3
    for _ in range(num_layer):
        lp = {
            "w1": _pad2(_xavier_uniform(keys[k + 0], (emb_dim, 2 * emb_dim)),
                        dp, hp).astype(jnp.bfloat16),
            "b1": jnp.zeros((1, hp), jnp.float32),
            "w2": _pad2(_xavier_uniform(keys[k + 1], (2 * emb_dim, emb_dim)),
                        hp, dp).astype(jnp.bfloat16),
            "b2": jnp.zeros((1, dp), jnp.float32),
            "edge_emb1": _pad2(_xavier_uniform(keys[k + 2], (NUM_BOND_TYPE, emb_dim)),
                               NUM_BOND_TYPE, dp),
            "edge_emb2": _pad2(_xavier_uniform(keys[k + 3], (NUM_BOND_DIRECTION, emb_dim)),
                               NUM_BOND_DIRECTION, dp),
            # gamma padded with 0 so padded feature columns remain exactly 0.
            "bn_gamma": jnp.pad(jnp.ones((1, emb_dim), jnp.float32),
                                ((0, 0), (0, dp - emb_dim))),
            "bn_beta": jnp.zeros((1, dp), jnp.float32),
        }
        params["layers"].append(lp)
        k += 4
    return params


# -------------------------------- forward ----------------------------------

def gnn_graphpred_forward(params, x, edge_index, edge_attr, batch,
                          *, num_layer, num_graphs, emb_dim, num_tasks):
    """Returns (graph_predictions [G, num_tasks], node_representation [N, emb_dim])."""
    n = x.shape[0]
    dp = params["x_emb1"].shape[1]

    # --- tiling geometry ------------------------------------------------------
    # tm multiple of 16 (bf16 sublane tile); prefer >=2 row tiles when the graph
    # allows so the "parallel" axis splits across v7x's two TensorCores.
    rn = _round_up(n, 16)
    if rn <= 128:
        tm = rn
    elif rn <= 256:
        tm = 128
    else:
        tm = 256
    n_pad = _round_up(n, tm)

    e_tot = edge_attr.shape[0] + n                 # original edges + self loops
    k_raw = n_pad + e_tot
    tk = min(1024, _round_up(k_raw, 128))          # big reduction tile (v6e feedback)
    k_pad = _round_up(k_raw, tk)

    # node input embedding (glue: gather), padded rows zero, cast once to bf16
    h = params["x_emb1"][x[:, 0]] + params["x_emb2"][x[:, 1]]
    h = jnp.pad(h, ((0, n_pad - n), (0, 0))).astype(jnp.bfloat16)

    # add self loops (shared by every GIN layer)
    loop = jnp.arange(n, dtype=edge_index.dtype)
    ei = jnp.concatenate([edge_index, jnp.stack([loop, loop], axis=0)], axis=1)
    self_loop_attr = jnp.concatenate(
        [jnp.full((n, 1), 4, edge_attr.dtype), jnp.zeros((n, 1), edge_attr.dtype)],
        axis=1)
    ea = jnp.concatenate([edge_attr, self_loop_attr], axis=0)
    src, tgt = ei[0], ei[1]

    # combined [adjacency | incidence] built DIRECTLY in bf16 with one scatter-add
    # (small integer counts -> exact in bf16; no f32 intermediate / concat / cast).
    rows = jnp.concatenate([tgt, tgt])
    cols = jnp.concatenate([src, n_pad + jnp.arange(e_tot, dtype=src.dtype)])
    m_bf16 = jnp.zeros((n_pad, k_pad), jnp.bfloat16).at[rows, cols].add(
        jnp.ones((2 * e_tot,), jnp.bfloat16))

    pad_rows = jnp.zeros((k_pad - k_raw, dp), jnp.bfloat16)

    # large row tile for the memory-bound BN apply pass
    bn_tm = tm
    while bn_tm * 2 <= min(n_pad, 2048) and n_pad % (bn_tm * 2) == 0:
        bn_tm *= 2

    for layer in range(num_layer):
        lp = params["layers"][layer]
        # per-edge embeddings (glue: gather) stacked under the node features, bf16
        edge_emb = (lp["edge_emb1"][ea[:, 0]] + lp["edge_emb2"][ea[:, 1]]
                    ).astype(jnp.bfloat16)
        s = jnp.concatenate([h, edge_emb, pad_rows], axis=0)   # bf16 (k_pad, dp)

        h2, stats = gin_mlp(m_bf16, s, lp["w1"], lp["b1"], lp["w2"], lp["b2"],
                            n_valid=n, tm=tm, tk=tk)

        # finalize BN batch statistics from per-row-tile partials (tiny)
        tot = stats.reshape(-1, 8, dp).sum(axis=0)
        mean = tot[0] / n
        var = jnp.maximum(tot[1] / n - mean * mean, 0.0)   # biased, torch BN train mode
        scale = lp["bn_gamma"][0] * jax.lax.rsqrt(var + EPS_BN)
        shift = lp["bn_beta"][0] - mean * scale

        apply_relu = layer != num_layer - 1     # last layer: no ReLU (matches GNN.forward)
        h = bn_apply(h2, scale[None, :], shift[None, :],
                     n_valid=n, tm=bn_tm, apply_relu=apply_relu)

    node_representation = h          # JK == 'last', bf16 (n_pad, dp)

    # global mean pool: exact bf16 one-hot sums in-kernel, 1/count + bias outside
    g_pad = _round_up(num_graphs, 16)
    one_hot = (batch[None, :] ==
               jnp.arange(num_graphs, dtype=batch.dtype)[:, None])
    counts = jnp.maximum(one_hot.sum(axis=1).astype(jnp.float32), 1.0)
    pool_mat = jnp.pad(one_hot.astype(jnp.bfloat16),
                       ((0, g_pad - num_graphs), (0, n_pad - n)))

    raw = pool_and_predict(pool_mat, node_representation, params["pred_w"], tm=tm)
    pred = (raw[:num_graphs, :num_tasks] / counts[:, None]
            + params["pred_b"][0, :num_tasks])
    node_rep = node_representation[:n, :emb_dim].astype(jnp.float32)
    return pred, node_rep


# ----------------------------- pure-JAX reference ----------------------------

def _reference_forward(params, x, edge_index, edge_attr, batch,
                       *, num_layer, num_graphs, emb_dim, num_tasks):
    n = x.shape[0]
    h = params["x_emb1"][x[:, 0], :emb_dim] + params["x_emb2"][x[:, 1], :emb_dim]
    loop = jnp.arange(n, dtype=edge_index.dtype)
    ei = jnp.concatenate([edge_index, jnp.stack([loop, loop], axis=0)], axis=1)
    self_loop_attr = jnp.concatenate(
        [jnp.full((n, 1), 4, edge_attr.dtype), jnp.zeros((n, 1), edge_attr.dtype)], axis=1)
    ea = jnp.concatenate([edge_attr, self_loop_attr], axis=0)
    src, tgt = ei[0], ei[1]
    for layer in range(num_layer):
        lp = params["layers"][layer]
        w1 = lp["w1"].astype(jnp.float32)[:emb_dim, :2 * emb_dim]
        w2 = lp["w2"].astype(jnp.float32)[:2 * emb_dim, :emb_dim]
        edge_emb = lp["edge_emb1"][ea[:, 0], :emb_dim] + lp["edge_emb2"][ea[:, 1], :emb_dim]
        msg = h[src] + edge_emb
        aggr = jnp.zeros((n, emb_dim), jnp.float32).at[tgt].add(msg)
        h1 = jnp.maximum(aggr @ w1 + lp["b1"][0, :2 * emb_dim], 0.0)
        h2 = h1 @ w2 + lp["b2"][0, :emb_dim]
        mean = h2.mean(axis=0)
        var = h2.var(axis=0)
        hn = (lp["bn_gamma"][0, :emb_dim] * (h2 - mean) * jax.lax.rsqrt(var + EPS_BN)
              + lp["bn_beta"][0, :emb_dim])
        h = jnp.maximum(hn, 0.0) if layer != num_layer - 1 else hn
    one_hot = (batch[None, :] ==
               jnp.arange(num_graphs, dtype=batch.dtype)[:, None]).astype(jnp.float32)
    pooled = (one_hot @ h) / jnp.maximum(one_hot.sum(axis=1, keepdims=True), 1.0)
    pred_w = params["pred_w"].astype(jnp.float32)[:emb_dim, :num_tasks]
    pred = pooled @ pred_w + params["pred_b"][0, :num_tasks]
    return pred, h


# --------------------------------- main -------------------------------------

if __name__ == "__main__":
    num_layer, emb_dim, num_tasks = 2, 32, 4
    N, E, G = 16, 24, 2
    DP = _round_up(emb_dim, 128)
    HP = _round_up(2 * emb_dim, 128)
    TP = _round_up(num_tasks, 128)

    key = jax.random.PRNGKey(0)
    k1, k2, k3, k4, k5, kp = jax.random.split(key, 6)

    x = jnp.stack([
        jax.random.randint(k1, (N,), 0, NUM_ATOM_TYPE - 1),
        jax.random.randint(k2, (N,), 0, NUM_CHIRALITY_TAG),
    ], axis=1).astype(jnp.int32)

    edge_index = jax.random.randint(k3, (2, E), 0, N).astype(jnp.int32)
    edge_attr = jnp.stack([
        jax.random.randint(k4, (E,), 0, 4),
        jax.random.randint(k5, (E,), 0, NUM_BOND_DIRECTION),
    ], axis=1).astype(jnp.int32)

    batch = jnp.concatenate([jnp.zeros((N // 2,), jnp.int32),
                             jnp.ones((N - N // 2,), jnp.int32)])

    params = init_params(kp, num_layer, emb_dim, num_tasks, DP, HP, TP)

    fwd = jax.jit(functools.partial(
        gnn_graphpred_forward, num_layer=num_layer, num_graphs=G,
        emb_dim=emb_dim, num_tasks=num_tasks))

    pred, node_rep = fwd(params, x, edge_index, edge_attr, batch)
    jax.block_until_ready((pred, node_rep))

    ref_pred, ref_node = _reference_forward(
        params, x, edge_index, edge_attr, batch,
        num_layer=num_layer, num_graphs=G, emb_dim=emb_dim, num_tasks=num_tasks)

    assert pred.shape == (G, num_tasks)
    assert node_rep.shape == (N, emb_dim)
    assert jnp.all(jnp.isfinite(pred)) and jnp.all(jnp.isfinite(node_rep))
    # kernel path uses bf16 intermediates/weights -> compare vs f32 ref with 5e-2 tol
    assert jnp.allclose(pred, ref_pred, rtol=5e-2, atol=5e-2), \
        f"pred mismatch: {jnp.max(jnp.abs(pred - ref_pred))}"
    assert jnp.allclose(node_rep, ref_node, rtol=5e-2, atol=5e-2), \
        f"node_rep mismatch: {jnp.max(jnp.abs(node_rep - ref_node))}"
    print("KERNEL_OK")
</pallas_src>

<mosaic_0001>
module attributes {stable_mosaic.version = 11 : i64} {
  func.func @_bn_apply_kernel(%arg0: i32, %arg1: memref<16x128xbf16, #tpu.memory_space<vmem>>, %arg2: memref<1x128xf32, #tpu.memory_space<vmem>>, %arg3: memref<1x128xf32, #tpu.memory_space<vmem>>, %arg4: memref<16x128xbf16, #tpu.memory_space<vmem>>) attributes {dimension_semantics = [#tpu.dimension_semantics<parallel>], iteration_bounds = array<i64: 1>, scalar_prefetch = 0 : i64, scratch_operands = 0 : i64, tpu.core_type = #tpu.core_type<tc>, window_params = [{transform_indices = @transform_0, window_bounds = array<i64: 16, 128>}, {pipeline_mode = #tpu.pipeline_mode<synchronous>, transform_indices = @transform_1, window_bounds = array<i64: 1, 128>}, {pipeline_mode = #tpu.pipeline_mode<synchronous>, transform_indices = @transform_2, window_bounds = array<i64: 1, 128>}, {transform_indices = @transform_3, window_bounds = array<i64: 16, 128>}]} {
    %c0 = arith.constant 0 : index
    %c0_0 = arith.constant 0 : index
    %0 = vector.load %arg1[%c0, %c0_0] : memref<16x128xbf16, #tpu.memory_space<vmem>>, vector<16x128xbf16>
    %1 = arith.extf %0 : vector<16x128xbf16> to vector<16x128xf32>
    %c0_1 = arith.constant 0 : index
    %c0_2 = arith.constant 0 : index
    %2 = vector.load %arg2[%c0_1, %c0_2] : memref<1x128xf32, #tpu.memory_space<vmem>>, vector<1x128xf32>
    %3 = vector.broadcast %2 : vector<1x128xf32> to vector<16x128xf32>
    %4 = arith.mulf %1, %3 : vector<16x128xf32>
    %c0_3 = arith.constant 0 : index
    %c0_4 = arith.constant 0 : index
    %5 = vector.load %arg3[%c0_3, %c0_4] : memref<1x128xf32, #tpu.memory_space<vmem>>, vector<1x128xf32>
    %6 = vector.broadcast %5 : vector<1x128xf32> to vector<16x128xf32>
    %7 = arith.addf %4, %6 : vector<16x128xf32>
    %cst = arith.constant 0.000000e+00 : f32
    %8 = vector.broadcast %cst : f32 to vector<16x128xf32>
    %9 = arith.maximumf %7, %8 : vector<16x128xf32>
    %10 = tpu.iota {dimensions = array<i32: 0>} : vector<16x128xi32>
    %c16_i32 = arith.constant 16 : i32
    %11 = arith.muli %arg0, %c16_i32 : i32
    %12 = vector.broadcast %11 : i32 to vector<16x128xi32>
    %13 = arith.addi %10, %12 : vector<16x128xi32>
    %c16_i32_5 = arith.constant 16 : i32
    %14 = vector.broadcast %c16_i32_5 : i32 to vector<16x128xi32>
    %15 = arith.cmpi slt, %13, %14 : vector<16x128xi32>
    %cst_6 = arith.constant 0.000000e+00 : f32
    %16 = vector.broadcast %cst_6 : f32 to vector<16x128xf32>
    %17 = arith.select %15, %9, %16 : vector<16x128xi1>, vector<16x128xf32>
    %18 = arith.truncf %17 : vector<16x128xf32> to vector<16x128xbf16>
    %c0_7 = arith.constant 0 : index
    %c0_8 = arith.constant 0 : index
    %19 = vector.load %arg4[%c0_7, %c0_8] : memref<16x128xbf16, #tpu.memory_space<vmem>>, vector<16x128xbf16>
    tpu.vector_store %arg4[%c0_7, %c0_8], %18 {strides = array<i32>} : memref<16x128xbf16, #tpu.memory_space<vmem>>, vector<16x128xbf16>,
    return
  }
  func.func @transform_0(%arg0: i32) -> (i32, i32) {
    %c0_i32 = arith.constant 0 : i32
    %c0_i32_0 = arith.constant 0 : i32
    return %arg0, %c0_i32 : i32, i32
  }
  func.func @transform_1(%arg0: i32) -> (i32, i32) {
    %c0_i32 = arith.constant 0 : i32
    %c0_i32_0 = arith.constant 0 : i32
    %c0_i32_1 = arith.constant 0 : i32
    return %c0_i32, %c0_i32_0 : i32, i32
  }
  func.func @transform_2(%arg0: i32) -> (i32, i32) {
    %c0_i32 = arith.constant 0 : i32
    %c0_i32_0 = arith.constant 0 : i32
    %c0_i32_1 = arith.constant 0 : i32
    return %c0_i32, %c0_i32_0 : i32, i32
  }
  func.func @transform_3(%arg0: i32) -> (i32, i32) {
    %c0_i32 = arith.constant 0 : i32
    %c0_i32_0 = arith.constant 0 : i32
    return %arg0, %c0_i32 : i32, i32
  }
}

module attributes {stable_mosaic.version = 11 : i64} {
  func.func @_bn_apply_kernel(%arg0: i32, %arg1: memref<16x128xbf16, #tpu.memory_space<vmem>>, %arg2: memref<1x128xf32, #tpu.memory_space<vmem>>, %arg3: memref<1x128xf32, #tpu.memory_space<vmem>>, %arg4: memref<16x128xbf16, #tpu.memory_space<vmem>>) attributes {dimension_semantics = [#tpu.dimension_semantics<parallel>], iteration_bounds = array<i64: 1>, scalar_prefetch = 0 : i64, scratch_operands = 0 : i64, tpu.core_type = #tpu.core_type<tc>, window_params = [{transform_indices = @transform_0, window_bounds = array<i64: 16, 128>}, {pipeline_mode = #tpu.pipeline_mode<synchronous>, transform_indices = @transform_1, window_bounds = array<i64: 1, 128>}, {pipeline_mode = #tpu.pipeline_mode<synchronous>, transform_indices = @transform_2, window_bounds = array<i64: 1, 128>}, {transform_indices = @transform_3, window_bounds = array<i64: 16, 128>}]} {
    %c0 = arith.constant 0 : index
    %c0_0 = arith.constant 0 : index
    %0 = vector.load %arg1[%c0, %c0_0] : memref<16x128xbf16, #tpu.memory_space<vmem>>, vector<16x128xbf16>
    %1 = arith.extf %0 : vector<16x128xbf16> to vector<16x128xf32>
    %c0_1 = arith.constant 0 : index
    %c0_2 = arith.constant 0 : index
    %2 = vector.load %arg2[%c0_1, %c0_2] : memref<1x128xf32, #tpu.memory_space<vmem>>, vector<1x128xf32>
    %3 = vector.broadcast %2 : vector<1x128xf32> to vector<16x128xf32>
    %4 = arith.mulf %1, %3 : vector<16x128xf32>
    %c0_3 = arith.constant 0 : index
    %c0_4 = arith.constant 0 : index
    %5 = vector.load %arg3[%c0_3, %c0_4] : memref<1x128xf32, #tpu.memory_space<vmem>>, vector<1x128xf32>
    %6 = vector.broadcast %5 : vector<1x128xf32> to vector<16x128xf32>
    %7 = arith.addf %4, %6 : vector<16x128xf32>
    %8 = tpu.iota {dimensions = array<i32: 0>} : vector<16x128xi32>
    %c16_i32 = arith.constant 16 : i32
    %9 = arith.muli %arg0, %c16_i32 : i32
    %10 = vector.broadcast %9 : i32 to vector<16x128xi32>
    %11 = arith.addi %8, %10 : vector<16x128xi32>
    %c16_i32_5 = arith.constant 16 : i32
    %12 = vector.broadcast %c16_i32_5 : i32 to vector<16x128xi32>
    %13 = arith.cmpi slt, %11, %12 : vector<16x128xi32>
    %cst = arith.constant 0.000000e+00 : f32
    %14 = vector.broadcast %cst : f32 to vector<16x128xf32>
    %15 = arith.select %13, %7, %14 : vector<16x128xi1>, vector<16x128xf32>
    %16 = arith.truncf %15 : vector<16x128xf32> to vector<16x128xbf16>
    %c0_6 = arith.constant 0 : index
    %c0_7 = arith.constant 0 : index
    %17 = vector.load %arg4[%c0_6, %c0_7] : memref<16x128xbf16, #tpu.memory_space<vmem>>, vector<16x128xbf16>
    tpu.vector_store %arg4[%c0_6, %c0_7], %16 {strides = array<i32>} : memref<16x128xbf16, #tpu.memory_space<vmem>>, vector<16x128xbf16>,
    return
  }
  func.func @transform_0(%arg0: i32) -> (i32, i32) {
    %c0_i32 = arith.constant 0 : i32
    %c0_i32_0 = arith.constant 0 : i32
    return %arg0, %c0_i32 : i32, i32
  }
  func.func @transform_1(%arg0: i32) -> (i32, i32) {
    %c0_i32 = arith.constant 0 : i32
    %c0_i32_0 = arith.constant 0 : i32
    %c0_i32_1 = arith.constant 0 : i32
    return %c0_i32, %c0_i32_0 : i32, i32
  }
  func.func @transform_2(%arg0: i32) -> (i32, i32) {
    %c0_i32 = arith.constant 0 : i32
    %c0_i32_0 = arith.constant 0 : i32
    %c0_i32_1 = arith.constant 0 : i32
    return %c0_i32, %c0_i32_0 : i32, i32
  }
  func.func @transform_3(%arg0: i32) -> (i32, i32) {
    %c0_i32 = arith.constant 0 : i32
    %c0_i32_0 = arith.constant 0 : i32
    return %arg0, %c0_i32 : i32, i32
  }
}

module attributes {stable_mosaic.version = 11 : i64} {
  func.func @_gin_mlp_kernel(%arg0: i32, %arg1: i32, %arg2: memref<16x128xbf16, #tpu.memory_space<vmem>>, %arg3: memref<128x128xbf16, #tpu.memory_space<vmem>>, %arg4: memref<128x128xbf16, #tpu.memory_space<vmem>>, %arg5: memref<1x128xf32, #tpu.memory_space<vmem>>, %arg6: memref<128x128xbf16, #tpu.memory_space<vmem>>, %arg7: memref<1x128xf32, #tpu.memory_space<vmem>>, %arg8: memref<16x128xbf16, #tpu.memory_space<vmem>>, %arg9: memref<8x128xf32, #tpu.memory_space<vmem>>, %arg10: memref<16x128xf32, #tpu.memory_space<vmem>>) attributes {dimension_semantics = [#tpu.dimension_semantics<parallel>, #tpu.dimension_semantics<arbitrary>], iteration_bounds = array<i64: 1, 1>, scalar_prefetch = 0 : i64, scratch_operands = 1 : i64, tpu.core_type = #tpu.core_type<tc>, window_params = [{transform_indices = @transform_0, window_bounds = array<i64: 16, 128>}, {transform_indices = @transform_1, window_bounds = array<i64: 128, 128>}, {pipeline_mode = #tpu.pipeline_mode<synchronous>, transform_indices = @transform_2, window_bounds = array<i64: 128, 128>}, {pipeline_mode = #tpu.pipeline_mode<synchronous>, transform_indices = @transform_3, window_bounds = array<i64: 1, 128>}, {pipeline_mode = #tpu.pipeline_mode<synchronous>, transform_indices = @transform_4, window_bounds = array<i64: 128, 128>}, {pipeline_mode = #tpu.pipeline_mode<synchronous>, transform_indices = @transform_5, window_bounds = array<i64: 1, 128>}, {transform_indices = @transform_6, window_bounds = array<i64: 16, 128>}, {transform_indices = @transform_7, window_bounds = array<i64: 8, 128>}]} {
    %c0_i32 = arith.constant 0 : i32
    %0 = arith.cmpi eq, %arg1, %c0_i32 : i32
    %1 = arith.extui %0 : i1 to i32
    %c0_i32_0 = arith.constant 0 : i32
    %2 = arith.cmpi ne, %1, %c0_i32_0 : i32
    scf.if %2 {
      %cst_10 = arith.constant 0.000000e+00 : f32
      %12 = vector.broadcast %cst_10 : f32 to vector<16x128xf32>
      %c0_11 = arith.constant 0 : index
      %c0_12 = arith.constant 0 : index
      %13 = vector.load %arg10[%c0_11, %c0_12] : memref<16x128xf32, #tpu.memory_space<vmem>>, vector<16x128xf32>
      tpu.vector_store %arg10[%c0_11, %c0_12], %12 {strides = array<i32>} : memref<16x128xf32, #tpu.memory_space<vmem>>, vector<16x128xf32>,
    } else {
    }
    %c0 = arith.constant 0 : index
    %c0_1 = arith.constant 0 : index
    %3 = vector.load %arg10[%c0, %c0_1] : memref<16x128xf32, #tpu.memory_space<vmem>>, vector<16x128xf32>
    %c0_2 = arith.constant 0 : index
    %c0_3 = arith.constant 0 : index
    %4 = vector.load %arg2[%c0_2, %c0_3] : memref<16x128xbf16, #tpu.memory_space<vmem>>, vector<16x128xbf16>
    %c0_4 = arith.constant 0 : index
    %c0_5 = arith.constant 0 : index
    %5 = vector.load %arg3[%c0_4, %c0_5] : memref<128x128xbf16, #tpu.memory_space<vmem>>, vector<128x128xbf16>
    %cst = arith.constant dense<0.000000e+00> : vector<16x128xf32>
    %6 = tpu.matmul %4, %5, %cst {dimension_numbers = #tpu.dot_dimension_numbers<[1], [0], [0], [1], [0, 0, 1, 1], [], []>} : vector<16x128xbf16>, vector<128x128xbf16>, vector<16x128xf32> -> vector<16x128xf32>
    %7 = arith.addf %3, %6 : vector<16x128xf32>
    %c0_6 = arith.constant 0 : index
    %c0_7 = arith.constant 0 : index
    %8 = vector.load %arg10[%c0_6, %c0_7] : memref<16x128xf32, #tpu.memory_space<vmem>>, vector<16x128xf32>
    tpu.vector_store %arg10[%c0_6, %c0_7], %7 {strides = array<i32>} : memref<16x128xf32, #tpu.memory_space<vmem>>, vector<16x128xf32>,
    %c0_i32_8 = arith.constant 0 : i32
    %9 = arith.cmpi eq, %arg1, %c0_i32_8 : i32
    %10 = arith.extui %9 : i1 to i32
    %c0_i32_9 = arith.constant 0 : i32
    %11 = arith.cmpi ne, %10, %c0_i32_9 : i32
    scf.if %11 {
      %c0_10 = arith.constant 0 : index
      %c0_11 = arith.constant 0 : index
      %12 = vector.load %arg10[%c0_10, %c0_11] : memref<16x128xf32, #tpu.memory_space<vmem>>, vector<16x128xf32>
      %13 = arith.truncf %12 : vector<16x128xf32> to vector<16x128xbf16>
      %c0_12 = arith.constant 0 : index
      %c0_13 = arith.constant 0 : index
      %14 = vector.load %arg4[%c0_12, %c0_13] : memref<128x128xbf16, #tpu.memory_space<vmem>>, vector<128x128xbf16>
      %cst_14 = arith.constant dense<0.000000e+00> : vector<16x128xf32>
      %15 = tpu.matmul %13, %14, %cst_14 {dimension_numbers = #tpu.dot_dimension_numbers<[1], [0], [0], [1], [0, 0, 1, 1], [], []>} : vector<16x128xbf16>, vector<128x128xbf16>, vector<16x128xf32> -> vector<16x128xf32>
      %c0_15 = arith.constant 0 : index
      %c0_16 = arith.constant 0 : index
      %16 = vector.load %arg5[%c0_15, %c0_16] : memref<1x128xf32, #tpu.memory_space<vmem>>, vector<1x128xf32>
      %17 = vector.broadcast %16 : vector<1x128xf32> to vector<16x128xf32>
      %18 = arith.addf %15, %17 : vector<16x128xf32>
      %cst_17 = arith.constant 0.000000e+00 : f32
      %19 = vector.broadcast %cst_17 : f32 to vector<16x128xf32>
      %20 = arith.maximumf %18, %19 : vector<16x128xf32>
      %21 = arith.truncf %20 : vector<16x128xf32> to vector<16x128xbf16>
      %c0_18 = arith.constant 0 : index
      %c0_19 = arith.constant 0 : index
      %22 = vector.load %arg6[%c0_18, %c0_19] : memref<128x128xbf16, #tpu.memory_space<vmem>>, vector<128x128xbf16>
      %cst_20 = arith.constant dense<0.000000e+00> : vector<16x128xf32>
      %23 = tpu.matmul %21, %22, %cst_20 {dimension_numbers = #tpu.dot_dimension_numbers<[1], [0], [0], [1], [0, 0, 1, 1], [], []>} : vector<16x128xbf16>, vector<128x128xbf16>, vector<16x128xf32> -> vector<16x128xf32>
      %c0_21 = arith.constant 0 : index
      %c0_22 = arith.constant 0 : index
      %24 = vector.load %arg7[%c0_21, %c0_22] : memref<1x128xf32, #tpu.memory_space<vmem>>, vector<1x128xf32>
      %25 = vector.broadcast %24 : vector<1x128xf32> to vector<16x128xf32>
      %26 = arith.addf %23, %25 : vector<16x128xf32>
      %27 = tpu.iota {dimensions = array<i32: 0>} : vector<16x128xi32>
      %c16_i32 = arith.constant 16 : i32
      %28 = arith.muli %arg0, %c16_i32 : i32
      %29 = vector.broadcast %28 : i32 to vector<16x128xi32>
      %30 = arith.addi %27, %29 : vector<16x128xi32>
      %c16_i32_23 = arith.constant 16 : i32
      %31 = vector.broadcast %c16_i32_23 : i32 to vector<16x128xi32>
      %32 = arith.cmpi slt, %30, %31 : vector<16x128xi32>
      %33 = arith.extui %32 : vector<16x128xi1> to vector<16x128xi32>
      %34 = arith.sitofp %33 : vector<16x128xi32> to vector<16x128xf32>
      %35 = arith.mulf %26, %34 : vector<16x128xf32>
      %cst_24 = arith.constant dense<0.000000e+00> : vector<128xf32>
      %36 = vector.multi_reduction <add>, %35, %cst_24 [0] : vector<16x128xf32> to vector<128xf32>
      %37 = vector.shape_cast %36 : vector<128xf32> to vector<1x128xf32>
      %38 = arith.mulf %35, %35 : vector<16x128xf32>
      %cst_25 = arith.constant dense<0.000000e+00> : vector<128xf32>
      %39 = vector.multi_reduction <add>, %38, %cst_25 [0] : vector<16x128xf32> to vector<128xf32>
      %40 = vector.shape_cast %39 : vector<128xf32> to vector<1x128xf32>
      %cst_26 = arith.constant 0.000000e+00 : f32
      %41 = vector.broadcast %cst_26 : f32 to vector<6x128xf32>
      %42 = tpu.concatenate %37, %40, %41 in 0 : vector<1x128xf32>, vector<1x128xf32>, vector<6x128xf32> -> vector<8x128xf32>
      %c0_27 = arith.constant 0 : index
      %c0_28 = arith.constant 0 : index
      %43 = vector.load %arg9[%c0_27, %c0_28] : memref<8x128xf32, #tpu.memory_space<vmem>>, vector<8x128xf32>
      tpu.vector_store %arg9[%c0_27, %c0_28], %42 {strides = array<i32>} : memref<8x128xf32, #tpu.memory_space<vmem>>, vector<8x128xf32>,
      %44 = arith.truncf %26 : vector<16x128xf32> to vector<16x128xbf16>
      %c0_29 = arith.constant 0 : index
      %c0_30 = arith.constant 0 : index
      %45 = vector.load %arg8[%c0_29, %c0_30] : memref<16x128xbf16, #tpu.memory_space<vmem>>, vector<16x128xbf16>
      tpu.vector_store %arg8[%c0_29, %c0_30], %44 {strides = array<i32>} : memref<16x128xbf16, #tpu.memory_space<vmem>>, vector<16x128xbf16>,
    } else {
    }
    return
  }
  func.func @transform_0(%arg0: i32, %arg1: i32) -> (i32, i32) {
    %c0_i32 = arith.constant 0 : i32
    return %arg0, %arg1 : i32, i32
  }
  func.func @transform_1(%arg0: i32, %arg1: i32) -> (i32, i32) {
    %c0_i32 = arith.constant 0 : i32
    %c0_i32_0 = arith.constant 0 : i32
    return %arg1, %c0_i32 : i32, i32
  }
  func.func @transform_2(%arg0: i32, %arg1: i32) -> (i32, i32) {
    %c0_i32 = arith.constant 0 : i32
    %c0_i32_0 = arith.constant 0 : i32
    %c0_i32_1 = arith.constant 0 : i32
    return %c0_i32, %c0_i32_0 : i32, i32
  }
  func.func @transform_3(%arg0: i32, %arg1: i32) -> (i32, i32) {
    %c0_i32 = arith.constant 0 : i32
    %c0_i32_0 = arith.constant 0 : i32
    %c0_i32_1 = arith.constant 0 : i32
    return %c0_i32, %c0_i32_0 : i32, i32
  }
  func.func @transform_4(%arg0: i32, %arg1: i32) -> (i32, i32) {
    %c0_i32 = arith.constant 0 : i32
    %c0_i32_0 = arith.constant 0 : i32
    %c0_i32_1 = arith.constant 0 : i32
    return %c0_i32, %c0_i32_0 : i32, i32
  }
  func.func @transform_5(%arg0: i32, %arg1: i32) -> (i32, i32) {
    %c0_i32 = arith.constant 0 : i32
    %c0_i32_0 = arith.constant 0 : i32
    %c0_i32_1 = arith.constant 0 : i32
    return %c0_i32, %c0_i32_0 : i32, i32
  }
  func.func @transform_6(%arg0: i32, %arg1: i32) -> (i32, i32) {
    %c0_i32 = arith.constant 0 : i32
    %c0_i32_0 = arith.constant 0 : i32
    return %arg0, %c0_i32 : i32, i32
  }
  func.func @transform_7(%arg0: i32, %arg1: i32) -> (i32, i32) {
    %c0_i32 = arith.constant 0 : i32
    %c0_i32_0 = arith.constant 0 : i32
    return %arg0, %c0_i32 : i32, i32
  }
}

module attributes {stable_mosaic.version = 11 : i64} {
  func.func @_pool_pred_kernel(%arg0: i32, %arg1: memref<16x16xbf16, #tpu.memory_space<vmem>>, %arg2: memref<16x128xbf16, #tpu.memory_space<vmem>>, %arg3: memref<128x128xbf16, #tpu.memory_space<vmem>>, %arg4: memref<16x128xf32, #tpu.memory_space<vmem>>, %arg5: memref<16x128xf32, #tpu.memory_space<vmem>>) attributes {dimension_semantics = [#tpu.dimension_semantics<arbitrary>], iteration_bounds = array<i64: 1>, scalar_prefetch = 0 : i64, scratch_operands = 1 : i64, tpu.core_type = #tpu.core_type<tc>, window_params = [{transform_indices = @transform_0, window_bounds = array<i64: 16, 16>}, {transform_indices = @transform_1, window_bounds = array<i64: 16, 128>}, {pipeline_mode = #tpu.pipeline_mode<synchronous>, transform_indices = @transform_2, window_bounds = array<i64: 128, 128>}, {pipeline_mode = #tpu.pipeline_mode<synchronous>, transform_indices = @transform_3, window_bounds = array<i64: 16, 128>}]} {
    %c0_i32 = arith.constant 0 : i32
    %0 = arith.cmpi eq, %arg0, %c0_i32 : i32
    %1 = arith.extui %0 : i1 to i32
    %c0_i32_0 = arith.constant 0 : i32
    %2 = arith.cmpi ne, %1, %c0_i32_0 : i32
    scf.if %2 {
      %cst_10 = arith.constant 0.000000e+00 : f32
      %12 = vector.broadcast %cst_10 : f32 to vector<16x128xf32>
      %c0_11 = arith.constant 0 : index
      %c0_12 = arith.constant 0 : index
      %13 = vector.load %arg5[%c0_11, %c0_12] : memref<16x128xf32, #tpu.memory_space<vmem>>, vector<16x128xf32>
      tpu.vector_store %arg5[%c0_11, %c0_12], %12 {strides = array<i32>} : memref<16x128xf32, #tpu.memory_space<vmem>>, vector<16x128xf32>,
    } else {
    }
    %c0 = arith.constant 0 : index
    %c0_1 = arith.constant 0 : index
    %3 = vector.load %arg5[%c0, %c0_1] : memref<16x128xf32, #tpu.memory_space<vmem>>, vector<16x128xf32>
    %c0_2 = arith.constant 0 : index
    %c0_3 = arith.constant 0 : index
    %4 = vector.load %arg1[%c0_2, %c0_3] : memref<16x16xbf16, #tpu.memory_space<vmem>>, vector<16x16xbf16>
    %c0_4 = arith.constant 0 : index
    %c0_5 = arith.constant 0 : index
    %5 = vector.load %arg2[%c0_4, %c0_5] : memref<16x128xbf16, #tpu.memory_space<vmem>>, vector<16x128xbf16>
    %cst = arith.constant dense<0.000000e+00> : vector<16x128xf32>
    %6 = tpu.matmul %4, %5, %cst {dimension_numbers = #tpu.dot_dimension_numbers<[1], [0], [0], [1], [0, 0, 1, 1], [], []>} : vector<16x16xbf16>, vector<16x128xbf16>, vector<16x128xf32> -> vector<16x128xf32>
    %7 = arith.addf %3, %6 : vector<16x128xf32>
    %c0_6 = arith.constant 0 : index
    %c0_7 = arith.constant 0 : index
    %8 = vector.load %arg5[%c0_6, %c0_7] : memref<16x128xf32, #tpu.memory_space<vmem>>, vector<16x128xf32>
    tpu.vector_store %arg5[%c0_6, %c0_7], %7 {strides = array<i32>} : memref<16x128xf32, #tpu.memory_space<vmem>>, vector<16x128xf32>,
    %c0_i32_8 = arith.constant 0 : i32
    %9 = arith.cmpi eq, %arg0, %c0_i32_8 : i32
    %10 = arith.extui %9 : i1 to i32
    %c0_i32_9 = arith.constant 0 : i32
    %11 = arith.cmpi ne, %10, %c0_i32_9 : i32
    scf.if %11 {
      %c0_10 = arith.constant 0 : index
      %c0_11 = arith.constant 0 : index
      %12 = vector.load %arg5[%c0_10, %c0_11] : memref<16x128xf32, #tpu.memory_space<vmem>>, vector<16x128xf32>
      %13 = arith.truncf %12 : vector<16x128xf32> to vector<16x128xbf16>
      %c0_12 = arith.constant 0 : index
      %c0_13 = arith.constant 0 : index
      %14 = vector.load %arg3[%c0_12, %c0_13] : memref<128x128xbf16, #tpu.memory_space<vmem>>, vector<128x128xbf16>
      %cst_14 = arith.constant dense<0.000000e+00> : vector<16x128xf32>
      %15 = tpu.matmul %13, %14, %cst_14 {dimension_numbers = #tpu.dot_dimension_numbers<[1], [0], [0], [1], [0, 0, 1, 1], [], []>} : vector<16x128xbf16>, vector<128x128xbf16>, vector<16x128xf32> -> vector<16x128xf32>
      %c0_15 = arith.constant 0 : index
      %c0_16 = arith.constant 0 : index
      %16 = vector.load %arg4[%c0_15, %c0_16] : memref<16x128xf32, #tpu.memory_space<vmem>>, vector<16x128xf32>
      tpu.vector_store %arg4[%c0_15, %c0_16], %15 {strides = array<i32>} : memref<16x128xf32, #tpu.memory_space<vmem>>, vector<16x128xf32>,
    } else {
    }
    return
  }
  func.func @transform_0(%arg0: i32) -> (i32, i32) {
    %c0_i32 = arith.constant 0 : i32
    %c0_i32_0 = arith.constant 0 : i32
    return %c0_i32, %arg0 : i32, i32
  }
  func.func @transform_1(%arg0: i32) -> (i32, i32) {
    %c0_i32 = arith.constant 0 : i32
    %c0_i32_0 = arith.constant 0 : i32
    return %arg0, %c0_i32 : i32, i32
  }
  func.func @transform_2(%arg0: i32) -> (i32, i32) {
    %c0_i32 = arith.constant 0 : i32
    %c0_i32_0 = arith.constant 0 : i32
    %c0_i32_1 = arith.constant 0 : i32
    return %c0_i32, %c0_i32_0 : i32, i32
  }
  func.func @transform_3(%arg0: i32) -> (i32, i32) {
    %c0_i32 = arith.constant 0 : i32
    %c0_i32_0 = arith.constant 0 : i32
    %c0_i32_1 = arith.constant 0 : i32
    return %c0_i32, %c0_i32_0 : i32, i32
  }
}

</mosaic_0001>

<bundles_post_ra>
// kernel: gnn_graphpred_forward.6
= control target key start
LH: loop header
LB: loop body
LE: loop exit
PB: predicated region body
PF: predicated region fallthrough
CT: control target
= control target key end

     0   :  { %s94_s0 = inlined_call_operand.vmem [shape: bf16[16,128], index: 0, kind: input, shape index: {}]   ;;  %s95_s1 = inlined_call_operand.vmem [shape: f32[1,128], index: 1, kind: input, shape index: {}]   ;;  %s96_s2 = inlined_call_operand.vmem [shape: f32[1,128], index: 2, kind: input, shape index: {}]   ;;  %s97_s3 = inlined_call_operand.vmem [shape: bf16[16,128], index: 3, kind: output, shape index: {}]  }
   0x1   :  { %v52_v0 = vld [vmem:[%s94_s0] sm:$0xff]  }
   0x2   :  { %v60_v1 = vld [vmem:[%s95_s1] ss:$0 sm:$0xff]  ;;  %v53_v2 = vunpack.c.l.bf16 %v52_v0  ;;  %v54_v3 = vunpack.c.h.bf16 %v52_v0 }
   0x3   :  { %v61_v4 = vld [vmem:[%s96_s2] ss:$0 sm:$0xff] }
   0x4   :  { %v22_v5 = vmul.f32 %v60_v1, %v53_v2  ;;  %v23_v6 = vmul.f32 %v60_v1, %v54_v3 }
   0x6   :  { %v28_v7 = vadd.f32 %v61_v4, %v22_v5  ;;  %v29_v8 = vadd.f32 %v61_v4, %v23_v6 }
   0x8   :  { %v30_v9 = vmax.f32 %v28_v7, 0.0  ;;  %v31_v10 = vmax.f32 %v29_v8, 0.0 }
   0xa   :  { %v58_v11 = vpack.c.bf16 %v31_v10, %v30_v9 }
   0xc   :  { %59 = vst [vmem:[%s97_s3] sm:$0xff] %v58_v11  }

// kernel: gnn_graphpred_forward.8
= control target key start
LH: loop header
LB: loop body
LE: loop exit
PB: predicated region body
PF: predicated region fallthrough
CT: control target
= control target key end

     0   :  { %s92_s0 = inlined_call_operand.vmem [shape: bf16[16,128], index: 0, kind: input, shape index: {}]   ;;  %s93_s1 = inlined_call_operand.vmem [shape: f32[1,128], index: 1, kind: input, shape index: {}]   ;;  %s94_s2 = inlined_call_operand.vmem [shape: f32[1,128], index: 2, kind: input, shape index: {}]   ;;  %s95_s3 = inlined_call_operand.vmem [shape: bf16[16,128], index: 3, kind: output, shape index: {}]  }
   0x1   :  { %v50_v0 = vld [vmem:[%s92_s0] sm:$0xff]  }
   0x2   :  { %v58_v1 = vld [vmem:[%s93_s1] ss:$0 sm:$0xff]  ;;  %v51_v2 = vunpack.c.l.bf16 %v50_v0  ;;  %v52_v3 = vunpack.c.h.bf16 %v50_v0 }
   0x3   :  { %v59_v4 = vld [vmem:[%s94_s2] ss:$0 sm:$0xff] }
   0x4   :  { %v22_v5 = vmul.f32 %v58_v1, %v51_v2  ;;  %v23_v6 = vmul.f32 %v58_v1, %v52_v3 }
   0x6   :  { %v28_v7 = vadd.f32 %v59_v4, %v22_v5  ;;  %v29_v8 = vadd.f32 %v59_v4, %v23_v6 }
   0x8   :  { %v56_v9 = vpack.c.bf16 %v29_v8, %v28_v7 }
   0xa   :  { %57 = vst [vmem:[%s95_s3] sm:$0xff] %v56_v9  }

// kernel: gnn_graphpred_forward.5
= control target key start
LH: loop header
LB: loop body
LE: loop exit
PB: predicated region body
PF: predicated region fallthrough
CT: control target
= control target key end

     0   :  { %vm327_vm0 = vcmask 1040384   ;;  %vm329_vm1 = vcmask 1041408   ;;  %s603_s1 = inlined_call_operand.vmem [shape: bf16[128,128], index: 1, kind: input, shape index: {}]   ;;  %s604_s2 = inlined_call_operand.vmem [shape: bf16[128,128], index: 2, kind: input, shape index: {}]   ;;  %s605_s0 = inlined_call_operand.vmem [shape: bf16[16,128], index: 0, kind: input, shape index: {}]   ;;  %s606_s3 = inlined_call_operand.vmem [shape: f32[1,128], index: 3, kind: input, shape index: {}]   ;;  %s607_s4 = inlined_call_operand.vmem [shape: bf16[128,128], index: 4, kind: input, shape index: {}]   ;;  %s608_s5 = inlined_call_operand.vmem [shape: f32[1,128], index: 5, kind: input, shape index: {}]   ;;  %s609_s6 = inlined_call_operand.vmem [shape: bf16[16,128], index: 6, kind: output, shape index: {0}]   ;;  %s610_s7 = inlined_call_operand.vmem [shape: f32[8,128], index: 7, kind: output, shape index: {1}]  }
   0x1   :  { %v452_v0 = vld [vmem:[%s603_s1 + $0x38] sm:$0xff]  ;;  %v451_v1 = vld [vmem:[%s603_s1 + $0x30] sm:$0xff]  ;;  %v450_v4 = vld [vmem:[%s603_s1 + $0x28] sm:$0xff] }
   0x2   :  { %105 = vmatpush.bf16.msra.mxu0 %v452_v0  ;;  %v460_v2 = vld [vmem:[%s604_s2 + $0x38] sm:$0xff]  ;;  %v459_v3 = vld [vmem:[%s604_s2 + $0x30] sm:$0xff]  ;;  %v458_v5 = vld [vmem:[%s604_s2 + $0x28] sm:$0xff] }
   0x3   :  { %197 = vmatpush.bf16.msra.mxu1 %v460_v2  ;;  %v449_v6 = vld [vmem:[%s603_s1 + $0x20] sm:$0xff]  ;;  %v448_v8 = vld [vmem:[%s603_s1 + $0x18] sm:$0xff]  ;;  %v447_v10 = vld [vmem:[%s603_s1 + $0x10] sm:$0xff] }
   0x4   :  { %v457_v7 = vld [vmem:[%s604_s2 + $0x20] sm:$0xff]  ;;  %v456_v9 = vld [vmem:[%s604_s2 + $0x18] sm:$0xff]  ;;  %v446_v11 = vld [vmem:[%s603_s1 + $0x8] sm:$0xff] }
   0x5   :  { %v445_v12 = vld [vmem:[%s603_s1] sm:$0xff]  ;;  %v455_v14 = vld [vmem:[%s604_s2 + $0x10] sm:$0xff]  ;;  %v454_v15 = vld [vmem:[%s604_s2 + $0x8] sm:$0xff] }
   0x6   :  { %106 = vmatpush.bf16.msra.mxu0 %v451_v1  ;;  %v444_v13 = vld [vmem:[%s605_s0] sm:$0xff]  ;;  %v468_v17 = vld [vmem:[%s607_s4 + $0x38] sm:$0xff]  ;;  %v467_v18 = vld [vmem:[%s607_s4 + $0x30] sm:$0xff] }
   0x7   :  { %198 = vmatpush.bf16.msra.mxu1 %v459_v3  ;;  %v453_v16 = vld [vmem:[%s604_s2] sm:$0xff]  ;;  %282 = vmatpush.bf16.msra.mxu2 %v468_v17  ;;  %v466_v19 = vld [vmem:[%s607_s4 + $0x28] sm:$0xff]  ;;  %v464_v24 = vld [vmem:[%s607_s4 + $0x18] sm:$0xff] }
   0x8   :  { %v465_v20 = vld [vmem:[%s607_s4 + $0x20] sm:$0xff]  ;;  %v463_v25 = vld [vmem:[%s607_s4 + $0x10] sm:$0xff]  ;;  %v462_v26 = vld [vmem:[%s607_s4 + $0x8] sm:$0xff] }
   0x9   :  { %v461_v27 = vld [vmem:[%s607_s4] sm:$0xff] }
   0xa   :  { %107 = vmatpush.bf16.msra.mxu0 %v450_v4  ;;  %v474_v29 = vld [vmem:[%s606_s3] ss:$0 sm:$0xff] }
   0xb   :  { %199 = vmatpush.bf16.msra.mxu1 %v458_v5  ;;  %283 = vmatpush.bf16.msra.mxu2 %v467_v18  ;;  %v475_v37 = vld [vmem:[%s608_s5] ss:$0 sm:$0xff] }
   0xe   :  { %108 = vmatpush.bf16.msra.mxu0 %v449_v6 }
   0xf   :  { %200 = vmatpush.bf16.msra.mxu1 %v457_v7  ;;  %284 = vmatpush.bf16.msra.mxu2 %v466_v19 }
  0x12   :  { %109 = vmatpush.bf16.msra.mxu0 %v448_v8 }
  0x13   :  { %201 = vmatpush.bf16.msra.mxu1 %v456_v9  ;;  %285 = vmatpush.bf16.msra.mxu2 %v465_v20 }
  0x16   :  { %110 = vmatpush.bf16.msra.mxu0 %v447_v10 }
  0x17   :  { %202 = vmatpush.bf16.msra.mxu1 %v455_v14  ;;  %286 = vmatpush.bf16.msra.mxu2 %v464_v24 }
  0x1a   :  { %111 = vmatpush.bf16.msra.mxu0 %v446_v11 }
  0x1b   :  { %203 = vmatpush.bf16.msra.mxu1 %v454_v15  ;;  %287 = vmatpush.bf16.msra.mxu2 %v463_v25 }
  0x1e   :  { %112 = vmatpush.bf16.msra.mxu0 %v445_v12 }
  0x1f   :  { %204 = vmatpush.bf16.msra.mxu1 %v453_v16  ;;  %288 = vmatpush.bf16.msra.mxu2 %v462_v26 }
  0x21   :  { %113 = vmatmul.bf16.vlgmr.msra.gmra.mxu0 %v444_v13 }
  0x23   :  { %289 = vmatpush.bf16.msra.mxu2 %v461_v27 }
  0x9e   :  { %v114_v21 = vpop.f32.mrf.mxu0 }
  0xa6   :  { %v116_v22 = vpop.f32.mrf.mxu0 }
  0xa7   :  { %v128_v23 = vpack.c.bf16 %v116_v22, %v114_v21 }
  0xa9   :  { %205 = vmatmul.bf16.vlgmr.msra.gmra.mxu1 %v128_v23 }
 0x126   :  { %v206_v28 = vpop.f32.mrf.mxu1 }
 0x127   :  { %v207_v30 = vadd.f32 %v474_v29, %v206_v28 }
 0x129   :  { %v211_v33 = vmax.f32 %v207_v30, 0.0 }
 0x12e   :  { %v208_v31 = vpop.f32.mrf.mxu1 }
 0x12f   :  { %v209_v32 = vadd.f32 %v474_v29, %v208_v31 }
 0x131   :  { %v212_v34 = vmax.f32 %v209_v32, 0.0 }
 0x133   :  { %v213_v35 = vpack.c.bf16 %v212_v34, %v211_v33 }
 0x135   :  { %290 = vmatmul.bf16.vlgmr.msra.gmra.mxu2 %v213_v35 }
 0x1b8   :  { %v291_v36 = vpop.f32.mrf.mxu2 }
 0x1b9   :  { %v292_v38 = vadd.f32 %v475_v37, %v291_v36 }
 0x1bb   :  { %v318_v41 = vmul.f32 %v292_v38, %v292_v38 }
 0x1c0   :  { %v293_v39 = vpop.f32.mrf.mxu2 }
 0x1c1   :  { %v294_v40 = vadd.f32 %v475_v37, %v293_v39 }
 0x1c3   :  { %v311_v42 = vadd.f32 %v294_v40, %v292_v38  ;;  %v319_v43 = vmul.f32 %v294_v40, %v294_v40  ;;  %v472_v44 = vpack.c.bf16 %v294_v40, %v292_v38 }
 0x1c5   :  { %v312_v45 = vrot.slane %v311_v42, 4  ;;  %v320_v46 = vadd.f32 %v319_v43, %v318_v41  ;;  %473 = vst [vmem:[%s609_s6] sm:$0xff] %v472_v44  }
 0x1c7   :  { %v313_v47 = vadd.f32 %v312_v45, %v311_v42  ;;  %v321_v48 = vrot.slane %v320_v46, 4 }
 0x1c9   :  { %v314_v49 = vrot.slane %v313_v47, 2  ;;  %v322_v50 = vadd.f32 %v321_v48, %v320_v46 }
 0x1cb   :  { %v315_v51 = vadd.f32 %v314_v49, %v313_v47  ;;  %v323_v52 = vrot.slane %v322_v50, 2 }
 0x1cd   :  { %v316_v53 = vrot.slane %v315_v51, 1  ;;  %v324_v54 = vadd.f32 %v323_v52, %v322_v50 }
 0x1cf   :  { %v325_v55 = vrot.slane %v324_v54, 1  ;;  %v317_v56 = vadd.f32 %v316_v53, %v315_v51 }
 0x1d1   :  { %v326_v57 = vadd.f32 %v325_v55, %v324_v54 }
 0x1d3   :  { %v328_v58 = vsel %vm327_vm0, %v317_v56, %v326_v57 }
 0x1d4   :  { %v330_v59 = vsel %vm329_vm1, %v328_v58, 0.0 }
 0x1d5   :  { %331 = vst [vmem:[%s610_s7] sm:$0xff] %v330_v59 }

// kernel: gnn_graphpred_forward.9
= control target key start
LH: loop header
LB: loop body
LE: loop exit
PB: predicated region body
PF: predicated region fallthrough
CT: control target
= control target key end

     0   :  { %vm38_vm0 = vcmask 130048   ;;  %s257_s1 = inlined_call_operand.vmem [shape: bf16[16,128], index: 1, kind: input, shape index: {}]   ;;  %s258_s0 = inlined_call_operand.vmem [shape: bf16[16,16], index: 0, kind: input, shape index: {}]   ;;  %s259_s2 = inlined_call_operand.vmem [shape: bf16[128,128], index: 2, kind: input, shape index: {}]   ;;  %s260_s3 = inlined_call_operand.vmem [shape: f32[16,128], index: 3, kind: output, shape index: {}]  }
   0x1   :  { %v192_v0 = vld [vmem:[%s257_s1] sm:$0xff]  ;;  %v200_v1 = vld [vmem:[%s259_s2 + $0x38] sm:$0xff]  ;;  %v199_v3 = vld [vmem:[%s259_s2 + $0x30] sm:$0xff] }
   0x2   :  { %v191_v2 = vld [vmem:[%s258_s0] sm:$0xff]  ;;  %49 = vmatpush.bf16.msra.mxu0 %v192_v0  ;;  %130 = vmatpush.bf16.msra.mxu1 %v200_v1  ;;  %v198_v4 = vld [vmem:[%s259_s2 + $0x28] sm:$0xff]  ;;  %v196_v6 = vld [vmem:[%s259_s2 + $0x18] sm:$0xff] }
   0x3   :  { %v197_v5 = vld [vmem:[%s259_s2 + $0x20] sm:$0xff]  ;;  %v195_v7 = vld [vmem:[%s259_s2 + $0x10] sm:$0xff]  ;;  %v194_v8 = vld [vmem:[%s259_s2 + $0x8] sm:$0xff] }
   0x4   :  { %v193_v9 = vld [vmem:[%s259_s2] sm:$0xff] }
   0x5   :  { %158 = vmatmul.msk.bf16.vlgmr.msra.gmra.mxu0 %vm38_vm0, %v191_v2 }
   0x6   :  { %131 = vmatpush.bf16.msra.mxu1 %v199_v3 }
   0xa   :  { %132 = vmatpush.bf16.msra.mxu1 %v198_v4 }
   0xe   :  { %133 = vmatpush.bf16.msra.mxu1 %v197_v5 }
  0x12   :  { %134 = vmatpush.bf16.msra.mxu1 %v196_v6 }
  0x16   :  { %135 = vmatpush.bf16.msra.mxu1 %v195_v7 }
  0x1a   :  { %136 = vmatpush.bf16.msra.mxu1 %v194_v8 }
  0x1e   :  { %137 = vmatpush.bf16.msra.mxu1 %v193_v9 }
  0x82   :  { %v51_v10 = vpop.f32.mrf.mxu0 }
  0x8a   :  { %v53_v11 = vpop.f32.mrf.mxu0 }
  0x8b   :  { %v65_v12 = vpack.c.bf16 %v53_v11, %v51_v10 }
  0x8d   :  { %138 = vmatmul.bf16.vlgmr.msra.gmra.mxu1 %v65_v12 }
 0x10a   :  { %v139_v13 = vpop.f32.mrf.mxu1 }
 0x10b   :  { %144 = vst [vmem:[%s260_s3] sm:$0xff] %v139_v13 }
 0x112   :  { %v141_v14 = vpop.f32.mrf.mxu1 }
 0x113   :  { %145 = vst [vmem:[%s260_s3 + $0x8] sm:$0xff] %v141_v14 }

</bundles_post_ra>
